<compile_context>
chip_gen: v5e
topology: v5e:2x2
jax: 0.10.0
libtpu: 0.0.40
codegen_flags: <defaults>
</compile_context>

<pallas_src>
from functools import partial

import jax
import jax.numpy as jnp
from jax.experimental import pallas as pl
from jax.experimental.pallas import tpu as pltpu

_VMEM_LIMIT = 48 * 1024 * 1024


# ----------------------------------------------------------------------------
# Helpers
# ----------------------------------------------------------------------------
def _row_tiling(n_rows):
    """Pick a row tile. Prefer >= 2 grid steps (v7x has 2 TensorCores) and tiles
    in the 128-1024 range; never pad in HBM."""
    for t in (1024, 512, 256, 128, 64, 32, 16, 8):
        if n_rows % t == 0 and n_rows // t >= 2:
            return t, n_rows // t
    for t in (1024, 512, 256, 128, 64, 32, 16, 8):
        if n_rows % t == 0:
            return t, n_rows // t
    # Ragged row count: rely on Pallas partial (masked) boundary blocks.
    t = 256
    return t, pl.cdiv(n_rows, t)


def _choose_mode_block(m, per_mode_bytes, budget=4 * 1024 * 1024):
    """Largest mode block that fits a small VMEM budget while keeping >= 2 grid steps."""
    divisors = [d for d in range(1, m + 1) if m % d == 0]
    ok2 = [d for d in divisors if d * per_mode_bytes <= budget and m // d >= 2]
    if ok2:
        return max(ok2)
    ok1 = [d for d in divisors if d * per_mode_bytes <= budget]
    return max(ok1) if ok1 else 1


def _block_diag(w, pack):
    """pack copies of w on the diagonal: (Cin, Cout) -> (pack*Cin, pack*Cout)."""
    cin, cout = w.shape
    bd = jnp.zeros((pack * cin, pack * cout), w.dtype)
    for j in range(pack):
        bd = bd.at[j * cin:(j + 1) * cin, j * cout:(j + 1) * cout].set(w)
    return bd


# ----------------------------------------------------------------------------
# Kernel 1: pointwise linear (+ optional extra add, + optional activation)
# ----------------------------------------------------------------------------
def _linear_kernel(*refs, act, has_extra):
    if has_extra:
        x_ref, w_ref, b_ref, e_ref, o_ref = refs
    else:
        x_ref, w_ref, b_ref, o_ref = refs
    # bf16 MXU operands, f32 accumulation; all pointwise math stays f32.
    y = jnp.dot(x_ref[...].astype(jnp.bfloat16), w_ref[...],
                preferred_element_type=jnp.float32)
    y = y + b_ref[...]
    if has_extra:
        y = y + e_ref[...]
    if act == "relu":
        y = jnp.maximum(y, 0.0)
    elif act == "sigmoid":
        y = jax.nn.sigmoid(y)
    o_ref[...] = y.astype(o_ref.dtype)


def pallas_linear(x2d, w, b, extra=None, act="none"):
    """x2d: (N, Cin) f32, w: (Cin, Cout) bf16, b: (Cout,) f32, extra: (N, Cout) f32."""
    N, Cin = x2d.shape
    Cout = w.shape[1]
    tile, grid_len = _row_tiling(N)

    in_specs = [
        pl.BlockSpec((tile, Cin), lambda i: (i, 0)),
        pl.BlockSpec((Cin, Cout), lambda i: (0, 0)),
        pl.BlockSpec((1, Cout), lambda i: (0, 0)),
    ]
    args = [x2d, w, b.reshape(1, Cout)]
    if extra is not None:
        in_specs.append(pl.BlockSpec((tile, Cout), lambda i: (i, 0)))
        args.append(extra)

    bytes_accessed = N * Cin * 4 + Cin * Cout * 2 + Cout * 4 + N * Cout * 4
    if extra is not None:
        bytes_accessed += N * Cout * 4
    cost = pl.CostEstimate(
        flops=2 * N * Cin * Cout + (2 if extra is not None else 1) * N * Cout,
        transcendentals=(N * Cout if act == "sigmoid" else 0),
        bytes_accessed=bytes_accessed,
    )

    kernel = partial(_linear_kernel, act=act, has_extra=extra is not None)
    return pl.pallas_call(
        kernel,
        out_shape=jax.ShapeDtypeStruct((N, Cout), jnp.float32),
        grid=(grid_len,),
        in_specs=in_specs,
        out_specs=pl.BlockSpec((tile, Cout), lambda i: (i, 0)),
        compiler_params=pltpu.CompilerParams(
            dimension_semantics=("parallel",), vmem_limit_bytes=_VMEM_LIMIT),
        cost_estimate=cost,
    )(*args)


# ----------------------------------------------------------------------------
# Kernel 2: fused MLP head  --  sigmoid( relu(x @ W1 + b1) @ W2 + b2 )
# ----------------------------------------------------------------------------
def _mlp_head_kernel(x_ref, w1_ref, b1_ref, w2_ref, b2_ref, o_ref):
    h = jnp.dot(x_ref[...].astype(jnp.bfloat16), w1_ref[...],
                preferred_element_type=jnp.float32)
    h = jnp.maximum(h + b1_ref[...], 0.0)
    y = jnp.dot(h.astype(jnp.bfloat16), w2_ref[...],
                preferred_element_type=jnp.float32) + b2_ref[...]
    o_ref[...] = jax.nn.sigmoid(y).astype(o_ref.dtype)


def pallas_mlp_head(x2d, w1, b1, w2, b2):
    """x2d: (N, Cin) f32, w1: (Cin, Ch) bf16, w2: (Ch, Cout) bf16 -> (N, Cout) f32."""
    N, Cin = x2d.shape
    Ch = w1.shape[1]
    Cout = w2.shape[1]
    tile, grid_len = _row_tiling(N)

    cost = pl.CostEstimate(
        flops=2 * N * (Cin * Ch + Ch * Cout),
        transcendentals=N * Cout,
        bytes_accessed=N * Cin * 4 + Cin * Ch * 2 + Ch * Cout * 2
                       + (Ch + Cout) * 4 + N * Cout * 4,
    )

    return pl.pallas_call(
        _mlp_head_kernel,
        out_shape=jax.ShapeDtypeStruct((N, Cout), jnp.float32),
        grid=(grid_len,),
        in_specs=[
            pl.BlockSpec((tile, Cin), lambda i: (i, 0)),
            pl.BlockSpec((Cin, Ch), lambda i: (0, 0)),
            pl.BlockSpec((1, Ch), lambda i: (0, 0)),
            pl.BlockSpec((Ch, Cout), lambda i: (0, 0)),
            pl.BlockSpec((1, Cout), lambda i: (0, 0)),
        ],
        out_specs=pl.BlockSpec((tile, Cout), lambda i: (i, 0)),
        compiler_params=pltpu.CompilerParams(
            dimension_semantics=("parallel",), vmem_limit_bytes=_VMEM_LIMIT),
        cost_estimate=cost,
    )(x2d, w1, b1.reshape(1, Ch), w2, b2.reshape(1, Cout))


# ----------------------------------------------------------------------------
# Kernel 3: mode-blocked complex matmul (spectral mixing of SpectralConv3d)
# ----------------------------------------------------------------------------
def _spectral_kernel(xr_ref, xi_ref, wr_ref, wi_ref, or_ref, oi_ref):
    xr = xr_ref[...]                      # (mb, B, Cin) bf16
    xi = xi_ref[...]
    wr = wr_ref[...]                      # (mb, Cin, Cout) bf16
    wi = wi_ref[...]
    # Standard 4-matmul complex multiply (no Gauss cancellation with bf16 operands);
    # the kernel is weight-DMA bound so the extra MXU pass is free. f32 accumulation.
    rr = jnp.einsum("mbi,mio->mbo", xr, wr, preferred_element_type=jnp.float32)
    ii = jnp.einsum("mbi,mio->mbo", xi, wi, preferred_element_type=jnp.float32)
    ri = jnp.einsum("mbi,mio->mbo", xr, wi, preferred_element_type=jnp.float32)
    ir = jnp.einsum("mbi,mio->mbo", xi, wr, preferred_element_type=jnp.float32)
    or_ref[...] = rr - ii
    oi_ref[...] = ri + ir


def pallas_spectral_modes(xr, xi, wr, wi):
    """xr/xi: (M, B, Cin) bf16 ; wr/wi: (M, Cin, Cout) bf16 -> (real, imag) f32 (M, B, Cout)."""
    M, B, Cin = xr.shape
    Cout = wr.shape[2]
    per_mode_bytes = (2 * B * Cin + 2 * Cin * Cout) * 2 + 2 * B * Cout * 4
    mb = _choose_mode_block(M, per_mode_bytes)
    grid_len = M // mb
    # Deeper buffering on the weight streams once the mode grid is long enough to
    # keep the (dominant) weight DMA hidden.
    w_pipe = dict(pipeline_mode=pl.Buffered(3)) if grid_len >= 4 else {}

    cost = pl.CostEstimate(
        flops=8 * M * B * Cin * Cout,
        transcendentals=0,
        bytes_accessed=2 * M * B * Cin * 2 + 2 * M * Cin * Cout * 2
                       + 2 * M * B * Cout * 4,
    )

    out_r, out_i = pl.pallas_call(
        _spectral_kernel,
        out_shape=(
            jax.ShapeDtypeStruct((M, B, Cout), jnp.float32),
            jax.ShapeDtypeStruct((M, B, Cout), jnp.float32),
        ),
        grid=(grid_len,),
        in_specs=[
            pl.BlockSpec((mb, B, Cin), lambda i: (i, 0, 0)),
            pl.BlockSpec((mb, B, Cin), lambda i: (i, 0, 0)),
            pl.BlockSpec((mb, Cin, Cout), lambda i: (i, 0, 0), **w_pipe),
            pl.BlockSpec((mb, Cin, Cout), lambda i: (i, 0, 0), **w_pipe),
        ],
        out_specs=(
            pl.BlockSpec((mb, B, Cout), lambda i: (i, 0, 0)),
            pl.BlockSpec((mb, B, Cout), lambda i: (i, 0, 0)),
        ),
        compiler_params=pltpu.CompilerParams(
            dimension_semantics=("parallel",), vmem_limit_bytes=_VMEM_LIMIT),
        cost_estimate=cost,
    )(xr, xi, wr, wi)
    return out_r, out_i


# ----------------------------------------------------------------------------
# SpectralConv3d (channels-last). Truncated separable FFTs stay in plain JAX.
# ----------------------------------------------------------------------------
def spectral_conv3d(x, wr, wi, modes):
    """x: (B, D, H, W, Cin) f32 ; wr/wi: (m1*m2*m3, Cin, Cout) bf16 (pre-laid-out)."""
    m1, m2, m3 = modes
    B, D, H, W, Cin = x.shape
    Cout = wr.shape[2]
    M = m1 * m2 * m3

    # TODO(synk): no Pallas FFT primitive on TPU; transforms stay in jnp.fft (XLA).
    # Truncated forward transform: transform one axis, then keep only the retained
    # modes before the next axis (identical to rfftn + low-corner slice).
    xf = jnp.fft.rfft(x, axis=3)[:, :, :, :m3, :]
    xf = jnp.fft.fft(xf, axis=2)[:, :, :m2, :, :]
    xf = jnp.fft.fft(xf, axis=1)[:, :m1, :, :, :]                 # (B,m1,m2,m3,Cin) c64

    xm = jnp.transpose(xf, (1, 2, 3, 0, 4)).reshape(M, B, Cin)
    xr = jnp.real(xm).astype(jnp.bfloat16)
    xi = jnp.imag(xm).astype(jnp.bfloat16)

    out_r, out_i = pallas_spectral_modes(xr, xi, wr, wi)          # f32 (M, B, Cout)
    om = jax.lax.complex(out_r, out_i)
    om = om.reshape(m1, m2, m3, B, Cout).transpose(3, 0, 1, 2, 4)  # (B,m1,m2,m3,Cout)

    # Truncated inverse transform: per-axis zero-padding via `n=` is exactly the
    # reference's zeros + corner scatter + irfftn, without the full complex slab.
    y = jnp.fft.ifft(om, n=D, axis=1)
    y = jnp.fft.ifft(y, n=H, axis=2)
    y = jnp.fft.irfft(y, n=W, axis=3)
    return y.astype(jnp.float32)


# ----------------------------------------------------------------------------
# FNO3D forward
# ----------------------------------------------------------------------------
def fno3d_forward(x, params):
    """x: (B, D, H, W, in_c+3) f32  ->  (B, D, H, W, out_c) f32."""
    B, D, H, W, cin = x.shape
    N = B * D * H * W
    pack = params["pack"]
    width = params["width"]
    out_c = params["out_c"]
    modes = params["modes"]
    assert N % pack == 0, "B*D*H*W must be a multiple of the lane-packing factor"
    Np = N // pack

    # fc0 (lane-packed, no activation): (N, cin) viewed as (N/pack, pack*cin).
    h = pallas_linear(x.reshape(Np, pack * cin),
                      params["fc0_w_bd"], params["fc0_b_p"])       # (Np, pack*width)

    # 4 x [ relu( SpectralConv3d(h) + Conv3d_1x1(h) ) ]; residual add + relu fused
    # into the lane-packed 1x1 conv.
    for l in range(4):
        h5 = h.reshape(B, D, H, W, width)
        spec = spectral_conv3d(h5, params["spec_wr"][l], params["spec_wi"][l], modes)
        h = pallas_linear(h, params["conv_w_bd"][l], params["conv_b_p"][l],
                          extra=spec.reshape(Np, pack * width), act="relu")

    # fc1(relu) + fc2(sigmoid) fused into one lane-packed pass.
    out = pallas_mlp_head(h, params["fc1_w_bd"], params["fc1_b_p"],
                          params["fc2_w_bd"], params["fc2_b_p"])   # (Np, pack*out_c)
    return out.reshape(B, D, H, W, out_c)


# ----------------------------------------------------------------------------
# Deterministic parameter init (shapes as in the PyTorch __init__).
# Weights are stored bf16, pre-split (real/imag) and pre-laid-out (M, Cin, Cout) for
# the spectral layers, and pre-built as pack-fold block-diagonal matrices for the
# lane-packed pointwise layers. Biases stay f32.
# NOTE: PyTorch init uses torch.rand / cfloat; we use scaled normals (forward math
# is identical, parameter values are not bit-comparable).
# ----------------------------------------------------------------------------
def init_params(key, m1, m2, m3, width, in_c=3, out_c=3, pack=4):
    ks = jax.random.split(key, 24)
    p = {"modes": (m1, m2, m3), "width": width, "out_c": out_c, "pack": pack}

    fc0_w = 0.1 * jax.random.normal(ks[0], (in_c + 3, width), jnp.float32)
    fc0_b = 0.1 * jax.random.normal(ks[1], (width,), jnp.float32)
    p["fc0_w_bd"] = _block_diag(fc0_w, pack).astype(jnp.bfloat16)
    p["fc0_b_p"] = jnp.tile(fc0_b, pack)

    p["spec_wr"], p["spec_wi"], p["conv_w_bd"], p["conv_b_p"] = [], [], [], []
    idx = 2
    scale = 1.0 / (width * width)
    M = m1 * m2 * m3
    for _ in range(4):
        # Generated like the PyTorch parameter (Cin, Cout, m1, m2, m3) complex,
        # then laid out once here as real/imag (M, Cin, Cout) bf16.
        wr = scale * jax.random.normal(ks[idx], (width, width, m1, m2, m3), jnp.float32)
        wi = scale * jax.random.normal(ks[idx + 1], (width, width, m1, m2, m3), jnp.float32)
        p["spec_wr"].append(
            jnp.transpose(wr, (2, 3, 4, 0, 1)).reshape(M, width, width).astype(jnp.bfloat16))
        p["spec_wi"].append(
            jnp.transpose(wi, (2, 3, 4, 0, 1)).reshape(M, width, width).astype(jnp.bfloat16))
        cw = 0.05 * jax.random.normal(ks[idx + 2], (width, width), jnp.float32)
        cb = 0.05 * jax.random.normal(ks[idx + 3], (width,), jnp.float32)
        p["conv_w_bd"].append(_block_diag(cw, pack).astype(jnp.bfloat16))
        p["conv_b_p"].append(jnp.tile(cb, pack))
        idx += 4

    fc1_w = 0.05 * jax.random.normal(ks[idx], (width, 128), jnp.float32)
    fc1_b = 0.05 * jax.random.normal(ks[idx + 1], (128,), jnp.float32)
    fc2_w = 0.05 * jax.random.normal(ks[idx + 2], (128, out_c), jnp.float32)
    fc2_b = 0.05 * jax.random.normal(ks[idx + 3], (out_c,), jnp.float32)
    p["fc1_w_bd"] = _block_diag(fc1_w, pack).astype(jnp.bfloat16)
    p["fc1_b_p"] = jnp.tile(fc1_b, pack)
    p["fc2_w_bd"] = _block_diag(fc2_w, pack).astype(jnp.bfloat16)
    p["fc2_b_p"] = jnp.tile(fc2_b, pack)
    return p


if __name__ == "__main__":
    # Small shapes: batch=2, spatial 8x8x8, in_c=3 (+3 grid coords -> 6 input channels),
    # width=32, Fourier modes (4,4,4), out_c=3.
    B, D, H, W = 2, 8, 8, 8
    in_c, out_c, width = 3, 3, 32
    m1 = m2 = m3 = 4

    key = jax.random.PRNGKey(0)
    k_x, k_p = jax.random.split(key)
    x = jax.random.normal(k_x, (B, D, H, W, in_c + 3), jnp.float32)
    params = init_params(k_p, m1, m2, m3, width, in_c=in_c, out_c=out_c)

    out = fno3d_forward(x, params)
    out = jax.block_until_ready(out)

    assert out.shape == (B, D, H, W, out_c), out.shape
    assert bool(jnp.all(jnp.isfinite(out)))
    assert bool(jnp.all((out >= 0.0) & (out <= 1.0)))  # sigmoid output range
    print("KERNEL_OK")
</pallas_src>

<mosaic_0001>
module attributes {stable_mosaic.version = 11 : i64} {
  func.func @_linear_kernel(%arg0: i32, %arg1: memref<128x24xf32, #tpu.memory_space<vmem>>, %arg2: memref<24x128xbf16, #tpu.memory_space<vmem>>, %arg3: memref<1x128xf32, #tpu.memory_space<vmem>>, %arg4: memref<128x128xf32, #tpu.memory_space<vmem>>) attributes {dimension_semantics = [#tpu.dimension_semantics<parallel>], iteration_bounds = array<i64: 2>, scalar_prefetch = 0 : i64, scratch_operands = 0 : i64, tpu.core_type = #tpu.core_type<tc>, window_params = [{transform_indices = @transform_0, window_bounds = array<i64: 128, 24>}, {pipeline_mode = #tpu.pipeline_mode<synchronous>, transform_indices = @transform_1, window_bounds = array<i64: 24, 128>}, {pipeline_mode = #tpu.pipeline_mode<synchronous>, transform_indices = @transform_2, window_bounds = array<i64: 1, 128>}, {transform_indices = @transform_3, window_bounds = array<i64: 128, 128>}]} {
    %c0 = arith.constant 0 : index
    %c0_0 = arith.constant 0 : index
    %0 = vector.load %arg1[%c0, %c0_0] : memref<128x24xf32, #tpu.memory_space<vmem>>, vector<128x24xf32>
    %1 = arith.truncf %0 : vector<128x24xf32> to vector<128x24xbf16>
    %c0_1 = arith.constant 0 : index
    %c0_2 = arith.constant 0 : index
    %2 = vector.load %arg2[%c0_1, %c0_2] : memref<24x128xbf16, #tpu.memory_space<vmem>>, vector<24x128xbf16>
    %cst = arith.constant dense<0.000000e+00> : vector<128x128xf32>
    %3 = tpu.matmul %1, %2, %cst {dimension_numbers = #tpu.dot_dimension_numbers<[1], [0], [0], [1], [0, 0, 1, 1], [], []>} : vector<128x24xbf16>, vector<24x128xbf16>, vector<128x128xf32> -> vector<128x128xf32>
    %c0_3 = arith.constant 0 : index
    %c0_4 = arith.constant 0 : index
    %4 = vector.load %arg3[%c0_3, %c0_4] : memref<1x128xf32, #tpu.memory_space<vmem>>, vector<1x128xf32>
    %5 = vector.broadcast %4 : vector<1x128xf32> to vector<128x128xf32>
    %6 = arith.addf %3, %5 : vector<128x128xf32>
    %c0_5 = arith.constant 0 : index
    %c0_6 = arith.constant 0 : index
    %7 = vector.load %arg4[%c0_5, %c0_6] : memref<128x128xf32, #tpu.memory_space<vmem>>, vector<128x128xf32>
    tpu.vector_store %arg4[%c0_5, %c0_6], %6 {strides = array<i32>} : memref<128x128xf32, #tpu.memory_space<vmem>>, vector<128x128xf32>,
    return
  }
  func.func @transform_0(%arg0: i32) -> (i32, i32) {
    %c0_i32 = arith.constant 0 : i32
    %c0_i32_0 = arith.constant 0 : i32
    return %arg0, %c0_i32 : i32, i32
  }
  func.func @transform_1(%arg0: i32) -> (i32, i32) {
    %c0_i32 = arith.constant 0 : i32
    %c0_i32_0 = arith.constant 0 : i32
    %c0_i32_1 = arith.constant 0 : i32
    return %c0_i32, %c0_i32_0 : i32, i32
  }
  func.func @transform_2(%arg0: i32) -> (i32, i32) {
    %c0_i32 = arith.constant 0 : i32
    %c0_i32_0 = arith.constant 0 : i32
    %c0_i32_1 = arith.constant 0 : i32
    return %c0_i32, %c0_i32_0 : i32, i32
  }
  func.func @transform_3(%arg0: i32) -> (i32, i32) {
    %c0_i32 = arith.constant 0 : i32
    %c0_i32_0 = arith.constant 0 : i32
    return %arg0, %c0_i32 : i32, i32
  }
}

</mosaic_0001>

<bundles_post_ra>
// kernel: tpu_custom_call.1
= control target key start
LH: loop header
LB: loop body
LE: loop exit
PB: predicated region body
PF: predicated region fallthrough
CT: control target
= control target key end

     0   :  { %8 = vsyncpa [#allocation3], 0  ;;  %s687_s0 = inlined_call_operand.vmem [shape: f32[256,24], index: 0, kind: input, shape index: {}]   ;;  %s688_s1 = inlined_call_operand.vmem [shape: bf16[24,128], index: 1, kind: input, shape index: {}]   ;;  %s689_s2 = inlined_call_operand.vmem [shape: f32[1,128], index: 2, kind: input, shape index: {}]   ;;  %s690_s3 = inlined_call_operand.hbm [shape: f32[256,128], index: 3, kind: output, shape index: {}]  }
   0x1   :  { %10 = vsyncpa [#allocation3 + $0x1], 0  ;;  %s545_s12 = smov 0   ;;  %s547_s13 = smov 0  }
   0x2   :  { %s549_s14 = smov 0   ;;  %s551_s15 = smov 0  }
   0x3 LB: > { %s566_s16 = sadd.s32 4294967295, %s521_s15   ;;  %s385_s17 = sadd.s32 4294967294, %s521_s15   ;;  %s521_s15 = sphi %s551_s15, %s696_s15   ;;  %s517_s14 = sphi %s549_s14, %s695_s14   ;;  %s513_s13 = sphi %s547_s13, %s694_s13   ;;  %s509_s12 = sphi %s545_s12, %s693_s12  }
   0x4   : > { %s570_s18 = sadd.s32 1, %s521_s15   ;;  %s91_s19 = sadd.s32 1, %s517_s14 }
   0x5   : > { %s88_s20 = ssub.s32 %s521_s15, %s570_s18  ;;  %p101_p0 = scmp.ne.s32.totalorder %s517_s14, %s513_s13 }
   0x6   : > { %p89_p1 = scmp.eq.s32.totalorder %s88_s20, 0  ;;  %p102_p2 = scmp.eq.s32.totalorder %s566_s16, 1 }
   0x7   : > { %p107_p3 = scmp.ne.s32.totalorder %s513_s13, %s509_s12  ;;  %p108_p4 = scmp.eq.s32.totalorder %s385_s17, 1 }
   0x8   : > { %s581_s21 = scalar_select %p89_p1, %s517_s14, %s91_s19  }
   0x9   : > { %p583_p5 = por %p102_p2, %p101_p0  ;;  %p587_p6 = por %p108_p4, %p107_p3 }
   0xa   : > { %p388_p7 = scmp.ge.s32.totalorder %s521_s15, 1  ;;  %p141_p8 = scmp.lt.s32.totalorder %s521_s15, 3 }
   0xc   : > { %p142_p9 = pnand %p388_p7, %p141_p8 }
   0xd   : > { %s390_s26 = sshll.u32 (!%p142_p9), %s566_s16, 4  ;;  %s162_s6 = sand.u32 (!%p142_p9), 1, %s513_s13  }
   0xe   : > { %145 = sbr.rel (%p142_p9) target bundleno = 196 (0xc4), region = 32  ;;  %p166_p10 = scmp.lt.s32.totalorder (!%p142_p9), %s390_s26, 31 }
   0xf   : > { %s389_s7 = sshll.u32 (!%p142_p9), %s162_s6, 7  ;;  %s410_s11 = sshll.u32 (!%p142_p9), %s566_s16, 7 }
  0x10   : > { %s635_s10 = scalar_lea.vmem (!%p142_p9), [#allocation2], %s389_s7  ;;  %s319_s20 = scalar_lea.hbm (!%p142_p9), %s690_s3, %s410_s11 }
  0x11   : > { %s320_s24 = sshll.u32 (!%p142_p9), %s635_s10, 4  ;;  %s322_s16 = sshll.u32 (!%p142_p9), %s319_s20, 4  ;;  %s321_s24 = int_to_ptr.vmem [resolvable:$true] %s320_s24  ;;  %s323_s16 = int_to_ptr.hbm [resolvable:$true] %s322_s16 }
  0x12   : > { %s308_s25 = scalar_lea.sflag (!%p142_p9), [#allocation3], %s162_s6  ;;  %s479_s30 = scalar_lea.hbm (!%p142_p9), %s690_s3, 256 }
  0x13   : > { %v199_v0 = vld [vmem:[%s688_s1 + $0x8] sm:$0xf]  ;;  %vm238_vm0 = vcmask 1043456   ;;  %s698_s26 = smov (!%p166_p10, %s390_s26), 31  ;;  %v409_v4 = vld [vmem:[%s688_s1] sm:$0xff]  ;;  %vm213_vm1 = vcmask 195584  }
  0x14   : > { %v209_v1 = vunpack.c.l.b16 %v199_v0  ;;  %s391_s27 = sshll.u32 %s698_s26, 3  ;;  %v458_v29 = vld [vmem:[%s689_s2] ss:$0 sm:$0xff]  ;;  %s473_s26 = sshra.s32 %s323_s16, 4  ;;  %s474_s26 = int_to_ptr.hbm [resolvable:$true] %s473_s26 }
  0x15   : > { %s603_s5 = scalar_lea.vmem %s687_s0, %s391_s27  ;;  %s475_s27 = scalar_lea.hbm %s474_s26, 128 }
  0x16   : > { %v211_v2 = vpack.c.b16 %v209_v1, %v209_v1  ;;  %v173_v5 = vld [vmem:[%s603_s5] sm:$0xff]  ;;  %v174_v6 = vld [vmem:[%s603_s5 + $0x8] sm:$0xff]  ;;  %v175_v17 = vld [vmem:[%s603_s5 + $0x10] sm:$0xff]  ;;  %p476_p11 = scmp.ne.s32.totalorder %s474_s26, %s475_s27  ;;  %p480_p0 = scmp.lt.s32.totalorder %s474_s26, %s690_s3 }
  0x17   : > { %v177_v7 = vld [vmem:[%s603_s5 + $0x20] sm:$0xff]  ;;  %v178_v8 = vld [vmem:[%s603_s5 + $0x28] sm:$0xff]  ;;  %v189_v11 = vpack.c.bf16 %v174_v6, %v173_v5  ;;  %v176_v18 = vld [vmem:[%s603_s5 + $0x18] sm:$0xff]  ;;  %p481_p1 = scmp.lt.s32.totalorder %s479_s30, %s475_s27 }
  0x18   : > { %v240_v3 = vsel %vm238_vm0, %v211_v2, 0  ;;  %v181_v9 = vld [vmem:[%s603_s5 + $0x40] sm:$0xff]  ;;  %v182_v10 = vld [vmem:[%s603_s5 + $0x48] sm:$0xff]  ;;  %v191_v12 = vpack.c.bf16 %v178_v8, %v177_v7  ;;  %v179_v19 = vld [vmem:[%s603_s5 + $0x30] sm:$0xff]  ;;  %v190_v25 = vpack.c.bf16 %v176_v18, %v175_v17  ;;  %p477_p12 = pnand %p476_p11, %p583_p5 }
  0x19   : > { %248 = vmatpush.bf16.msra.mxu0 %v240_v3  ;;  %411 = vmatpush.bf16.msra.mxu1 %v240_v3  ;;  %v185_v13 = vld [vmem:[%s603_s5 + $0x60] sm:$0xff]  ;;  %v186_v14 = vld [vmem:[%s603_s5 + $0x68] sm:$0xff]  ;;  %v193_v15 = vpack.c.bf16 %v182_v10, %v181_v9  ;;  %v180_v20 = vld [vmem:[%s603_s5 + $0x38] sm:$0xff]  ;;  %p482_p2 = por %p481_p1, %p480_p0 }
  0x1a   : > { %412 = vmatpush.bf16.msra.mxu2 %v240_v3  ;;  %413 = vmatpush.bf16.msra.mxu3 %v240_v3  ;;  %v195_v16 = vpack.c.bf16 %v186_v14, %v185_v13  ;;  %v183_v21 = vld [vmem:[%s603_s5 + $0x50] sm:$0xff]  ;;  %v184_v22 = vld [vmem:[%s603_s5 + $0x58] sm:$0xff]  ;;  %v192_v26 = vpack.c.bf16 %v180_v20, %v179_v19  ;;  %p478_p13 = pneg %p477_p12 }
  0x1b   : > { %v187_v23 = vld [vmem:[%s603_s5 + $0x70] sm:$0xff]  ;;  %v188_v24 = vld [vmem:[%s603_s5 + $0x78] sm:$0xff]  ;;  %v194_v27 = vpack.c.bf16 %v184_v22, %v183_v21 }
  0x1c   : > { %v196_v28 = vpack.c.bf16 %v188_v24, %v187_v23  ;;  %p483_p3 = pnand %p482_p2, %p478_p13 }
  0x1d   : > { %249 = vmatpush.bf16.msra.mxu0 %v409_v4  ;;  %414 = vmatpush.bf16.msra.mxu1 %v409_v4 }
  0x1e   : > { %415 = vmatpush.bf16.msra.mxu2 %v409_v4  ;;  %416 = vmatpush.bf16.msra.mxu3 %v409_v4 }
  0x20   : > { %396 = vmatmul.msk.bf16.vlgmr.msra.gmra.mxu0 %vm213_vm1, %v189_v11  ;;  %398 = vmatmul.msk.bf16.vlgmr.msra.gmra.mxu1 %vm213_vm1, %v191_v12 }
  0x21   : > { %400 = vmatmul.msk.bf16.vlgmr.msra.gmra.mxu2 %vm213_vm1, %v193_v15  ;;  %402 = vmatmul.msk.bf16.vlgmr.msra.gmra.mxu3 %vm213_vm1, %v195_v16 }
  0x30   : > { %397 = vmatmul.msk.bf16.gmra.mxu0 %vm213_vm1, %v190_v25  ;;  %399 = vmatmul.msk.bf16.gmra.mxu1 %vm213_vm1, %v192_v26 }
  0x31   : > { %401 = vmatmul.msk.bf16.gmra.mxu2 %vm213_vm1, %v194_v27  ;;  %403 = vmatmul.msk.bf16.gmra.mxu3 %vm213_vm1, %v196_v28 }
  0x9d   : > { %v251_v30 = vpop.f32.mrf.mxu0  ;;  %v261_v31 = vpop.f32.mrf.mxu1 }
  0x9e   : > { %v252_v32 = vadd.f32 %v458_v29, %v251_v30  ;;  %v262_v33 = vadd.f32 %v458_v29, %v261_v31 }
  0xa0   : > { %291 = vst [vmem:[%s635_s10] sm:$0xff] %v252_v32 }
  0xa1   : > { %295 = vst [vmem:[%s635_s10 + $0x20] sm:$0xff] %v262_v33 }
  0xa4   : > { %v271_v34 = vpop.f32.mrf.mxu2  ;;  %v281_v35 = vpop.f32.mrf.mxu3 }
  0xa5   : > { %v272_v36 = vadd.f32 %v458_v29, %v271_v34  ;;  %v282_v37 = vadd.f32 %v458_v29, %v281_v35  ;;  %v253_v38 = vpop.f32.mrf.mxu0  ;;  %v263_v39 = vpop.f32.mrf.mxu1 }
  0xa6   : > { %v254_v40 = vadd.f32 %v458_v29, %v253_v38  ;;  %v264_v41 = vadd.f32 %v458_v29, %v263_v39 }
  0xa7   : > { %299 = vst [vmem:[%s635_s10 + $0x40] sm:$0xff] %v272_v36 }
  0xa8   : > { %303 = vst [vmem:[%s635_s10 + $0x60] sm:$0xff] %v282_v37 }
  0xa9   : > { %292 = vst [vmem:[%s635_s10 + $0x8] sm:$0xff] %v254_v40 }
  0xaa   : > { %296 = vst [vmem:[%s635_s10 + $0x28] sm:$0xff] %v264_v41 }
  0xac   : > { %v273_v42 = vpop.f32.mrf.mxu2  ;;  %v283_v43 = vpop.f32.mrf.mxu3 }
  0xad   : > { %v274_v44 = vadd.f32 %v458_v29, %v273_v42  ;;  %v284_v45 = vadd.f32 %v458_v29, %v283_v43  ;;  %v256_v46 = vpop.f32.mrf.mxu0  ;;  %v266_v47 = vpop.f32.mrf.mxu1 }
  0xae   : > { %v257_v48 = vadd.f32 %v458_v29, %v256_v46  ;;  %v267_v49 = vadd.f32 %v458_v29, %v266_v47 }
  0xaf   : > { %300 = vst [vmem:[%s635_s10 + $0x48] sm:$0xff] %v274_v44 }
  0xb0   : > { %304 = vst [vmem:[%s635_s10 + $0x68] sm:$0xff] %v284_v45 }
  0xb1   : > { %293 = vst [vmem:[%s635_s10 + $0x10] sm:$0xff] %v257_v48 }
  0xb2   : > { %297 = vst [vmem:[%s635_s10 + $0x30] sm:$0xff] %v267_v49 }
  0xb4   : > { %v276_v50 = vpop.f32.mrf.mxu2  ;;  %v286_v51 = vpop.f32.mrf.mxu3 }
  0xb5   : > { %v277_v52 = vadd.f32 %v458_v29, %v276_v50  ;;  %v287_v53 = vadd.f32 %v458_v29, %v286_v51  ;;  %v258_v54 = vpop.f32.mrf.mxu0  ;;  %v268_v55 = vpop.f32.mrf.mxu1 }
  0xb6   : > { %v259_v56 = vadd.f32 %v458_v29, %v258_v54  ;;  %v269_v57 = vadd.f32 %v458_v29, %v268_v55 }
  0xb7   : > { %301 = vst [vmem:[%s635_s10 + $0x50] sm:$0xff] %v277_v52 }
  0xb8   : > { %305 = vst [vmem:[%s635_s10 + $0x70] sm:$0xff] %v287_v53 }
  0xb9   : > { %294 = vst [vmem:[%s635_s10 + $0x18] sm:$0xff] %v259_v56 }
  0xba   : > { %298 = vst [vmem:[%s635_s10 + $0x38] sm:$0xff] %v269_v57 }
  0xbc   : > { %v278_v58 = vpop.f32.mrf.mxu2  ;;  %v288_v59 = vpop.f32.mrf.mxu3 }
  0xbd   : > { %v279_v60 = vadd.f32 %v458_v29, %v278_v58  ;;  %v289_v61 = vadd.f32 %v458_v29, %v288_v59 }
  0xbf   : > { %302 = vst [vmem:[%s635_s10 + $0x58] sm:$0xff] %v279_v60 }
  0xc0   : > { %306 = vst [vmem:[%s635_s10 + $0x78] sm:$0xff] %v289_v61 }
  0xc1   : > { %486 = shalt.err (!%p483_p3)
}
  0xc2   : > { %s523_s6 = smov 128   ;;  %s524_s7 = smov 8  }
  0xc3   : > { %417 = dma.vmem_to_hbm [thread:$0]  (%p583_p5), %s321_s24, 2048, %s323_s16, %s308_s25, %s523_s6, %s523_s6, %s524_s7  }
  0xc4 PF: > { %p423_p4 = scmp.ge.s32.totalorder %s521_s15, 2  ;;  %s337_s8 = sand.u32 1, %s509_s12  }
  0xc5   : > { %s338_s9 = scalar_lea.sflag [#allocation3], %s337_s8 }
  0xc6   : > { %p420_p7 = pnand %p423_p4, %p587_p6 }
  0xc8   : > { %p421_p8 = pneg %p420_p7 }
  0xca   : > { %504 = dma.done.wait (%p421_p8), %s338_s9, 2048  }
  0xcb   : > { %506 = vsyncadd (%p421_p8), %s338_s9, 4294965248  ;;  %p13_p9 = scmp.ge.s32.totalorder %s570_s18, 4   ;;  %s693_s12 = smov %s513_s13 }
  0xcc   : > { %s694_s13 = smov %s517_s14  ;;  %s695_s14 = smov %s581_s21 }
  0xcd   : > { %s696_s15 = smov %s570_s18  ;;  %15 = sbr.rel (!%p13_p9) target bundleno = 3 (0x3), region = 67 }
  0xd2   :  { %344 = vsyncpa [#allocation3], 1 }
  0xd3   :  { %346 = vsyncpa [#allocation3 + $0x1], 1 }

</bundles_post_ra>
